<compile_context>
chip_gen: v7x
topology: tpu7x:2x2x1
jax: 0.10.0
libtpu: 0.0.40
codegen_flags: <defaults>
</compile_context>

<pallas_src>
import jax
import jax.numpy as jnp
from jax.experimental import pallas as pl
from jax.experimental.pallas import tpu as pltpu

LANE = 128


def drqn_kernel(x_ref, h0_ref, w_ref, b_ref, out_ref, h_scratch):
    """One DRQN step per grid point (ib, t).

    x_ref     : (1, bt, 128)   fp32   observation block for step t (zero-padded lanes)
    h0_ref    : (bt, 128)      fp32   initial hidden state (zero-padded lanes)
    w_ref     : (4, 128, 128)  bf16   [W1^T | W_hh^T | W_ih^T | W2^T], each lane-aligned
    b_ref     : (3, 128)       fp32   [b1 | b_ih+b_hh | b2], each at lane offset 0
    out_ref   : (1, bt, 256)   fp32   [h_new (128 lanes) | q (128 lanes)]
    h_scratch : (bt, 128)      fp32   hidden-state carry across the time grid axis
    """
    t = pl.program_id(1)

    @pl.when(t == 0)
    def _():
        h_scratch[...] = h0_ref[...]

    x = x_ref[0]            # (bt, 128) fp32
    h = h_scratch[...]      # (bt, 128) fp32

    # h @ W_hh^T — independent of fc1/ReLU, overlaps with the critical chain.
    mm_hh = jnp.dot(h.astype(jnp.bfloat16), w_ref[1],
                    preferred_element_type=jnp.float32)

    # fc1 + ReLU  (bf16 MXU operands, fp32 accumulate / elementwise).
    a = jnp.dot(x.astype(jnp.bfloat16), w_ref[0],
                preferred_element_type=jnp.float32) + b_ref[0:1, :]
    a = jnp.maximum(a, 0.0)

    # RNNCell(tanh):  h' = tanh(a @ W_ih^T + h @ W_hh^T + (b_ih + b_hh))
    pre = jnp.dot(a.astype(jnp.bfloat16), w_ref[2],
                  preferred_element_type=jnp.float32) + mm_hh + b_ref[1:2, :]
    h_new = jnp.tanh(pre)

    # fc2:  q = h' @ W2^T + b2   (padding lanes stay exactly zero everywhere).
    q = jnp.dot(h_new.astype(jnp.bfloat16), w_ref[3],
                preferred_element_type=jnp.float32) + b_ref[2:3, :]

    h_scratch[...] = h_new
    # Two 128-lane-aligned, unmasked stores: [h_new | q].
    out_ref[0, :, :LANE] = h_new
    out_ref[0, :, LANE:] = q


def pack_params(params):
    """One-time host-side packing into lane-aligned slabs (out of the hot path)."""
    w1, w_ih, w_hh, w2 = params["w1"], params["w_ih"], params["w_hh"], params["w2"]
    hidden, in_dim = w1.shape
    action = w2.shape[0]
    assert in_dim <= LANE and hidden <= LANE and action <= LANE

    w_slab = jnp.zeros((4, LANE, LANE), jnp.float32)
    w_slab = w_slab.at[0, :in_dim, :hidden].set(w1.T)     # fc1
    w_slab = w_slab.at[1, :hidden, :hidden].set(w_hh.T)   # rnn hidden-hidden
    w_slab = w_slab.at[2, :hidden, :hidden].set(w_ih.T)   # rnn input-hidden
    w_slab = w_slab.at[3, :hidden, :action].set(w2.T)     # fc2
    w_slab = w_slab.astype(jnp.bfloat16)

    b_slab = jnp.zeros((3, LANE), jnp.float32)
    b_slab = b_slab.at[0, :hidden].set(params["b1"])
    b_slab = b_slab.at[1, :hidden].set(params["b_ih"] + params["b_hh"])
    b_slab = b_slab.at[2, :action].set(params["b2"])

    return w_slab, b_slab, (in_dim, hidden, action)


def make_drqn_unroll(T, B, in_dim, hidden, action, batch_tile=None):
    """Builds jitted (q_seq, h_seq) = unroll(x_seq, h0, w_slab, b_slab).

    q_seq[t], h_seq[t] are exactly the module's forward() applied step by step
    (T=1 is the single-step forward).
    """
    bt = batch_tile or B
    assert B % bt == 0 and bt % 8 == 0, "batch tile must be a multiple of 8"
    grid = (B // bt, T)

    call = pl.pallas_call(
        drqn_kernel,
        out_shape=jax.ShapeDtypeStruct((T, B, 2 * LANE), jnp.float32),
        grid_spec=pltpu.PrefetchScalarGridSpec(
            num_scalar_prefetch=0,
            grid=grid,
            in_specs=[
                pl.BlockSpec((1, bt, LANE), lambda ib, t: (t, ib, 0)),      # x_t streamed
                pl.BlockSpec((bt, LANE), lambda ib, t: (ib, 0)),            # h0 (per batch tile)
                pl.BlockSpec((4, LANE, LANE), lambda ib, t: (0, 0, 0)),     # weights: resident
                pl.BlockSpec((3, LANE), lambda ib, t: (0, 0)),              # biases: resident
            ],
            out_specs=pl.BlockSpec((1, bt, 2 * LANE), lambda ib, t: (t, ib, 0)),
            scratch_shapes=[pltpu.VMEM((bt, LANE), jnp.float32)],           # hidden carry
        ),
        compiler_params=pltpu.CompilerParams(
            dimension_semantics=("parallel", "arbitrary")),
    )

    @jax.jit
    def unroll(x_seq, h0, w_slab, b_slab):
        # x_seq: (T, B, in_dim) fp32 ; h0: (B, hidden) fp32
        x_pad = jnp.zeros((T, B, LANE), jnp.float32).at[..., :in_dim].set(x_seq)
        h_pad = jnp.zeros((B, LANE), jnp.float32).at[:, :hidden].set(h0)
        out = call(x_pad, h_pad, w_slab, b_slab)          # (T, B, 256)
        h_seq = out[:, :, :hidden]                        # per-step hidden state
        q_seq = out[:, :, LANE:LANE + action]             # per-step Q-values
        return q_seq, h_seq

    return unroll


def init_params(key, input_dim, hidden_dim, action_dim):
    """Deterministic synthetic init matching the PyTorch parameter shapes/ranges."""
    ks = jax.random.split(key, 8)
    u = lambda k, shape, bound: jax.random.uniform(
        k, shape, jnp.float32, minval=-bound, maxval=bound)
    b_fc1 = 1.0 / jnp.sqrt(input_dim)
    b_rnn = 1.0 / jnp.sqrt(hidden_dim)
    b_fc2 = 1.0 / jnp.sqrt(hidden_dim)
    return {
        "w1":   u(ks[0], (hidden_dim, input_dim), b_fc1),    # fc1.weight
        "b1":   u(ks[1], (hidden_dim,),           b_fc1),    # fc1.bias
        "w_ih": u(ks[2], (hidden_dim, hidden_dim), b_rnn),   # rnn.weight_ih
        "b_ih": u(ks[3], (hidden_dim,),            b_rnn),   # rnn.bias_ih
        "w_hh": u(ks[4], (hidden_dim, hidden_dim), b_rnn),   # rnn.weight_hh
        "b_hh": u(ks[5], (hidden_dim,),            b_rnn),   # rnn.bias_hh
        "w2":   u(ks[6], (action_dim, hidden_dim), b_fc2),   # fc2.weight
        "b2":   u(ks[7], (action_dim,),            b_fc2),   # fc2.bias
    }


def drqn_reference_unroll(x_seq, h0, params):
    """Pure-JAX fp32 reference: the PyTorch forward applied step by step."""
    def step(h, x):
        a = jnp.maximum(x @ params["w1"].T + params["b1"], 0.0)
        h_new = jnp.tanh(a @ params["w_ih"].T + params["b_ih"]
                         + h @ params["w_hh"].T + params["b_hh"])
        q = h_new @ params["w2"].T + params["b2"]
        return h_new, (q, h_new)
    _, (q_seq, h_seq) = jax.lax.scan(step, h0, x_seq)
    return q_seq, h_seq


if __name__ == "__main__":
    T, B, INPUT_DIM, HIDDEN_DIM, ACTION_DIM = 8, 16, 32, 32, 16

    key = jax.random.PRNGKey(0)
    k_x, k_h, k_p = jax.random.split(key, 3)

    x_seq = jax.random.normal(k_x, (T, B, INPUT_DIM), jnp.float32)
    h0 = jax.random.normal(k_h, (B, HIDDEN_DIM), jnp.float32)
    params = init_params(k_p, INPUT_DIM, HIDDEN_DIM, ACTION_DIM)

    # One-time packing (hoisted out of the hot path) + jitted unrolled forward.
    w_slab, b_slab, dims = pack_params(params)
    unroll = make_drqn_unroll(T, B, *dims)

    q_seq, h_seq = unroll(x_seq, h0, w_slab, b_slab)
    jax.block_until_ready((q_seq, h_seq))

    q_ref, h_ref = drqn_reference_unroll(x_seq, h0, params)
    assert q_seq.shape == (T, B, ACTION_DIM) and h_seq.shape == (T, B, HIDDEN_DIM)

    err_q = float(jnp.max(jnp.abs(q_seq - q_ref)))
    err_h = float(jnp.max(jnp.abs(h_seq - h_ref)))
    # bf16 MXU operands (fp32 accumulation) across an 8-step recurrence
    # -> relaxed tolerance vs the fp32 reference.
    assert err_q < 7.5e-2, err_q
    assert err_h < 7.5e-2, err_h

    print("KERNEL_OK")
</pallas_src>

<mosaic_0001>
module attributes {stable_mosaic.version = 11 : i64} {
  func.func @drqn_kernel(%arg0: i32, %arg1: i32, %arg2: memref<1x16x128xf32, #tpu.memory_space<vmem>>, %arg3: memref<16x128xf32, #tpu.memory_space<vmem>>, %arg4: memref<4x128x128xbf16, #tpu.memory_space<vmem>>, %arg5: memref<3x128xf32, #tpu.memory_space<vmem>>, %arg6: memref<1x16x256xf32, #tpu.memory_space<vmem>>, %arg7: memref<16x128xf32, #tpu.memory_space<vmem>>) attributes {dimension_semantics = [#tpu.dimension_semantics<parallel>, #tpu.dimension_semantics<arbitrary>], iteration_bounds = array<i64: 1, 8>, scalar_prefetch = 0 : i64, scratch_operands = 1 : i64, tpu.core_type = #tpu.core_type<tc>, window_params = [{transform_indices = @transform_0, window_bounds = array<i64: 1, 16, 128>}, {transform_indices = @transform_1, window_bounds = array<i64: 16, 128>}, {pipeline_mode = #tpu.pipeline_mode<synchronous>, transform_indices = @transform_2, window_bounds = array<i64: 4, 128, 128>}, {pipeline_mode = #tpu.pipeline_mode<synchronous>, transform_indices = @transform_3, window_bounds = array<i64: 3, 128>}, {transform_indices = @transform_4, window_bounds = array<i64: 1, 16, 256>}]} {
    %c0_i32 = arith.constant 0 : i32
    %0 = arith.cmpi eq, %arg1, %c0_i32 : i32
    %1 = arith.extui %0 : i1 to i32
    %c0_i32_0 = arith.constant 0 : i32
    %2 = arith.cmpi ne, %1, %c0_i32_0 : i32
    scf.if %2 {
      %c0_31 = arith.constant 0 : index
      %c0_32 = arith.constant 0 : index
      %42 = vector.load %arg3[%c0_31, %c0_32] : memref<16x128xf32, #tpu.memory_space<vmem>>, vector<16x128xf32>
      %c0_33 = arith.constant 0 : index
      %c0_34 = arith.constant 0 : index
      %43 = vector.load %arg7[%c0_33, %c0_34] : memref<16x128xf32, #tpu.memory_space<vmem>>, vector<16x128xf32>
      tpu.vector_store %arg7[%c0_33, %c0_34], %42 {strides = array<i32>} : memref<16x128xf32, #tpu.memory_space<vmem>>, vector<16x128xf32>,
    } else {
    }
    %c0 = arith.constant 0 : index
    %c0_1 = arith.constant 0 : index
    %c0_2 = arith.constant 0 : index
    %3 = vector.load %arg2[%c0, %c0_1, %c0_2] : memref<1x16x128xf32, #tpu.memory_space<vmem>>, vector<1x16x128xf32>
    %4 = vector.shape_cast %3 : vector<1x16x128xf32> to vector<16x128xf32>
    %c0_3 = arith.constant 0 : index
    %c0_4 = arith.constant 0 : index
    %5 = vector.load %arg7[%c0_3, %c0_4] : memref<16x128xf32, #tpu.memory_space<vmem>>, vector<16x128xf32>
    %6 = arith.truncf %5 : vector<16x128xf32> to vector<16x128xbf16>
    %c1 = arith.constant 1 : index
    %c0_5 = arith.constant 0 : index
    %c0_6 = arith.constant 0 : index
    %7 = vector.load %arg4[%c1, %c0_5, %c0_6] : memref<4x128x128xbf16, #tpu.memory_space<vmem>>, vector<1x128x128xbf16>
    %8 = vector.shape_cast %7 : vector<1x128x128xbf16> to vector<128x128xbf16>
    %cst = arith.constant dense<0.000000e+00> : vector<16x128xf32>
    %9 = tpu.matmul %6, %8, %cst {dimension_numbers = #tpu.dot_dimension_numbers<[1], [0], [0], [1], [0, 0, 1, 1], [], []>} : vector<16x128xbf16>, vector<128x128xbf16>, vector<16x128xf32> -> vector<16x128xf32>
    %10 = arith.truncf %4 : vector<16x128xf32> to vector<16x128xbf16>
    %c0_7 = arith.constant 0 : index
    %c0_8 = arith.constant 0 : index
    %c0_9 = arith.constant 0 : index
    %11 = vector.load %arg4[%c0_7, %c0_8, %c0_9] : memref<4x128x128xbf16, #tpu.memory_space<vmem>>, vector<1x128x128xbf16>
    %12 = vector.shape_cast %11 : vector<1x128x128xbf16> to vector<128x128xbf16>
    %cst_10 = arith.constant dense<0.000000e+00> : vector<16x128xf32>
    %13 = tpu.matmul %10, %12, %cst_10 {dimension_numbers = #tpu.dot_dimension_numbers<[1], [0], [0], [1], [0, 0, 1, 1], [], []>} : vector<16x128xbf16>, vector<128x128xbf16>, vector<16x128xf32> -> vector<16x128xf32>
    %c0_11 = arith.constant 0 : index
    %c0_12 = arith.constant 0 : index
    %14 = vector.load %arg5[%c0_11, %c0_12] : memref<3x128xf32, #tpu.memory_space<vmem>>, vector<1x128xf32>
    %15 = vector.broadcast %14 : vector<1x128xf32> to vector<16x128xf32>
    %16 = arith.addf %13, %15 : vector<16x128xf32>
    %cst_13 = arith.constant 0.000000e+00 : f32
    %17 = vector.broadcast %cst_13 : f32 to vector<16x128xf32>
    %18 = arith.maximumf %16, %17 : vector<16x128xf32>
    %19 = arith.truncf %18 : vector<16x128xf32> to vector<16x128xbf16>
    %c2 = arith.constant 2 : index
    %c0_14 = arith.constant 0 : index
    %c0_15 = arith.constant 0 : index
    %20 = vector.load %arg4[%c2, %c0_14, %c0_15] : memref<4x128x128xbf16, #tpu.memory_space<vmem>>, vector<1x128x128xbf16>
    %21 = vector.shape_cast %20 : vector<1x128x128xbf16> to vector<128x128xbf16>
    %cst_16 = arith.constant dense<0.000000e+00> : vector<16x128xf32>
    %22 = tpu.matmul %19, %21, %cst_16 {dimension_numbers = #tpu.dot_dimension_numbers<[1], [0], [0], [1], [0, 0, 1, 1], [], []>} : vector<16x128xbf16>, vector<128x128xbf16>, vector<16x128xf32> -> vector<16x128xf32>
    %23 = arith.addf %22, %9 : vector<16x128xf32>
    %c1_17 = arith.constant 1 : index
    %c0_18 = arith.constant 0 : index
    %24 = vector.load %arg5[%c1_17, %c0_18] : memref<3x128xf32, #tpu.memory_space<vmem>>, vector<1x128xf32>
    %25 = vector.broadcast %24 : vector<1x128xf32> to vector<16x128xf32>
    %26 = arith.addf %23, %25 : vector<16x128xf32>
    %27 = math.tanh %26 : vector<16x128xf32>
    %28 = arith.truncf %27 : vector<16x128xf32> to vector<16x128xbf16>
    %c3 = arith.constant 3 : index
    %c0_19 = arith.constant 0 : index
    %c0_20 = arith.constant 0 : index
    %29 = vector.load %arg4[%c3, %c0_19, %c0_20] : memref<4x128x128xbf16, #tpu.memory_space<vmem>>, vector<1x128x128xbf16>
    %30 = vector.shape_cast %29 : vector<1x128x128xbf16> to vector<128x128xbf16>
    %cst_21 = arith.constant dense<0.000000e+00> : vector<16x128xf32>
    %31 = tpu.matmul %28, %30, %cst_21 {dimension_numbers = #tpu.dot_dimension_numbers<[1], [0], [0], [1], [0, 0, 1, 1], [], []>} : vector<16x128xbf16>, vector<128x128xbf16>, vector<16x128xf32> -> vector<16x128xf32>
    %c2_22 = arith.constant 2 : index
    %c0_23 = arith.constant 0 : index
    %32 = vector.load %arg5[%c2_22, %c0_23] : memref<3x128xf32, #tpu.memory_space<vmem>>, vector<1x128xf32>
    %33 = vector.broadcast %32 : vector<1x128xf32> to vector<16x128xf32>
    %34 = arith.addf %31, %33 : vector<16x128xf32>
    %c0_24 = arith.constant 0 : index
    %c0_25 = arith.constant 0 : index
    %35 = vector.load %arg7[%c0_24, %c0_25] : memref<16x128xf32, #tpu.memory_space<vmem>>, vector<16x128xf32>
    tpu.vector_store %arg7[%c0_24, %c0_25], %27 {strides = array<i32>} : memref<16x128xf32, #tpu.memory_space<vmem>>, vector<16x128xf32>,
    %c0_26 = arith.constant 0 : index
    %c0_27 = arith.constant 0 : index
    %c0_28 = arith.constant 0 : index
    %36 = vector.load %arg6[%c0_26, %c0_27, %c0_28] : memref<1x16x256xf32, #tpu.memory_space<vmem>>, vector<1x16x128xf32>
    %37 = vector.shape_cast %36 : vector<1x16x128xf32> to vector<16x128xf32>
    %38 = vector.shape_cast %27 : vector<16x128xf32> to vector<1x16x128xf32>
    tpu.vector_store %arg6[%c0_26, %c0_27, %c0_28], %38 {strides = array<i32>} : memref<1x16x256xf32, #tpu.memory_space<vmem>>, vector<1x16x128xf32>,
    %c0_29 = arith.constant 0 : index
    %c0_30 = arith.constant 0 : index
    %c128 = arith.constant 128 : index
    %39 = vector.load %arg6[%c0_29, %c0_30, %c128] : memref<1x16x256xf32, #tpu.memory_space<vmem>>, vector<1x16x128xf32>
    %40 = vector.shape_cast %39 : vector<1x16x128xf32> to vector<16x128xf32>
    %41 = vector.shape_cast %34 : vector<16x128xf32> to vector<1x16x128xf32>
    tpu.vector_store %arg6[%c0_29, %c0_30, %c128], %41 {strides = array<i32>} : memref<1x16x256xf32, #tpu.memory_space<vmem>>, vector<1x16x128xf32>,
    return
  }
  func.func @transform_0(%arg0: i32, %arg1: i32) -> (i32, i32, i32) {
    %c0_i32 = arith.constant 0 : i32
    %c0_i32_0 = arith.constant 0 : i32
    return %arg1, %arg0, %c0_i32 : i32, i32, i32
  }
  func.func @transform_1(%arg0: i32, %arg1: i32) -> (i32, i32) {
    %c0_i32 = arith.constant 0 : i32
    %c0_i32_0 = arith.constant 0 : i32
    return %arg0, %c0_i32 : i32, i32
  }
  func.func @transform_2(%arg0: i32, %arg1: i32) -> (i32, i32, i32) {
    %c0_i32 = arith.constant 0 : i32
    %c0_i32_0 = arith.constant 0 : i32
    %c0_i32_1 = arith.constant 0 : i32
    %c0_i32_2 = arith.constant 0 : i32
    return %c0_i32, %c0_i32_0, %c0_i32_1 : i32, i32, i32
  }
  func.func @transform_3(%arg0: i32, %arg1: i32) -> (i32, i32) {
    %c0_i32 = arith.constant 0 : i32
    %c0_i32_0 = arith.constant 0 : i32
    %c0_i32_1 = arith.constant 0 : i32
    return %c0_i32, %c0_i32_0 : i32, i32
  }
  func.func @transform_4(%arg0: i32, %arg1: i32) -> (i32, i32, i32) {
    %c0_i32 = arith.constant 0 : i32
    %c0_i32_0 = arith.constant 0 : i32
    return %arg1, %arg0, %c0_i32 : i32, i32, i32
  }
}

</mosaic_0001>

<bundles_post_ra>
// kernel: unroll.1
= control target key start
LH: loop header
LB: loop body
LE: loop exit
PB: predicated region body
PF: predicated region fallthrough
CT: control target
= control target key end

     0   :  { %s1163_s15 = smov 0   ;;  %s1165_s16 = smov 0   ;;  %s1357_s0 = inlined_call_operand.vmem [shape: f32[8,16,128], index: 0, kind: input, shape index: {}]   ;;  %s1358_s1 = inlined_call_operand.vmem [shape: f32[16,128], index: 1, kind: input, shape index: {}]   ;;  %s1359_s2 = inlined_call_operand.vmem [shape: bf16[4,128,128], index: 2, kind: input, shape index: {}]   ;;  %s1360_s3 = inlined_call_operand.vmem [shape: f32[3,128], index: 3, kind: input, shape index: {}]   ;;  %s1361_s4 = inlined_call_operand.vmem [shape: f32[8,16,256], index: 4, kind: output, shape index: {}]  }
   0x1   :  { %s1167_s17 = smov 0  }
   0x2 LB: > { %s23_s18 = sadd.s32 1, %s1130_s16  ;;  %p841_p0 = scmp.ge.s32.totalorder %s1134_s17, 1  ;;  %s1134_s17 = sphi %s1167_s17, %s14_s17   ;;  %s1130_s16 = sphi %s1165_s16, %s1363_s16   ;;  %s1126_s15 = sphi %s1163_s15, %s1362_s15  }
   0x3   : > { %p24_p1 = scmp.ge.s32.totalorder %s23_s18, 8  ;;  %p194_p2 = scmp.lt.s32.totalorder %s1134_s17, 9 }
   0x5   : > { %s1365_s18 = smov (%p24_p1, %s23_s18), 0  ;;  %p195_p3 = pnand %p841_p0, %p194_p2 }
   0x6   : > { %p235_p4 = scmp.lt.s32.totalorder (!%p195_p3), %s1126_s15, 7  ;;  %p846_p5 = scmp.ne.s32.totalorder (!%p195_p3), %s1126_s15, 0 }
   0x7   : > { %198 = sbr.rel (%p195_p3) target bundleno = 723 (0x2d3), region = 36 }
   0xe   : > { %s236_s19 = scalar_select %p235_p4, %s1126_s15, 7 }
   0xf   : > { %265 = sbr.rel (%p846_p5) target bundleno = 22 (0x16), region = 40  ;;  %v266_v0 = vld [vmem:[%s1358_s1] sm:$0xff] (!%p846_p5)  ;;  %v267_v1 = vld [vmem:[%s1358_s1 + $0x8] sm:$0xff] (!%p846_p5) }
  0x10   : > { %s932_s20 = sshll.u32 %s236_s19, 4  ;;  %s933_s21 = sshll.u32 %s236_s19, 5  ;;  %268 = vst [vmem:[#allocation2] sm:$0xff] (!%p846_p5), %v266_v0  ;;  %269 = vst [vmem:[#allocation2 + $0x8] sm:$0xff] (!%p846_p5), %v267_v1 }
  0x11   : > { %s1184_s24 = scalar_lea.vmem %s1357_s0, %s932_s20  ;;  %s1189_s27 = scalar_lea.vmem %s1361_s4, %s933_s21 }
  0x16 PF: > { %v1076_v2 = vld [vmem:[%s1359_s2] sm:$0xff]   ;;  %v1136_v3 = vmov 0.0   ;;  %v1077_v4 = vld [vmem:[%s1359_s2 + $0x8] sm:$0xff]   ;;  %vm1137_vm0 = vmmov 0   ;;  %v1078_v5 = vld [vmem:[%s1359_s2 + $0x10] sm:$0xff]  }
  0x17   : > { %990 = vmatprep.subr.bf16.mxu1 %v1136_v3  ;;  %970 = vmatprep.subr.bf16.mxu0 %v1136_v3  ;;  %v1084_v6 = vld [vmem:[%s1359_s2 + $0x40] sm:$0xff]   ;;  %v1079_v7 = vld [vmem:[%s1359_s2 + $0x18] sm:$0xff]   ;;  %v1085_v8 = vld [vmem:[%s1359_s2 + $0x48] sm:$0xff]  }
  0x18   : > { %991 = vmatpush3.bf16.msra.mxu1 %v1076_v2  ;;  %1006 = vmatprep.mubr.msk.bf16.mxu1 %vm1137_vm0, %v1136_v3  ;;  %v1080_v9 = vld [vmem:[%s1359_s2 + $0x20] sm:$0xff]   ;;  %v1086_v10 = vld [vmem:[%s1359_s2 + $0x50] sm:$0xff]   ;;  %v1081_v11 = vld [vmem:[%s1359_s2 + $0x28] sm:$0xff]  }
  0x19   : > { %992 = vmatprep.subr.bf16.mxu1 %v1136_v3  ;;  %986 = vmatprep.mubr.msk.bf16.mxu0 %vm1137_vm0, %v1136_v3  ;;  %v1087_v12 = vld [vmem:[%s1359_s2 + $0x58] sm:$0xff]   ;;  %v1082_v13 = vld [vmem:[%s1359_s2 + $0x30] sm:$0xff]   ;;  %v1088_v14 = vld [vmem:[%s1359_s2 + $0x60] sm:$0xff]  }
  0x1a   : > { %971 = vmatpush3.bf16.msra.mxu0 %v1084_v6  ;;  %v1083_v15 = vld [vmem:[%s1359_s2 + $0x38] sm:$0xff]   ;;  %v270_v16 = vld [vmem:[%s1184_s24] sm:$0xff]  ;;  %v271_v17 = vld [vmem:[%s1184_s24 + $0x8] sm:$0xff] }
  0x1b   : > { %972 = vmatprep.subr.bf16.mxu0 %v1136_v3  ;;  %v1089_v18 = vld [vmem:[%s1359_s2 + $0x68] sm:$0xff]   ;;  %v381_v19 = vpack.c.bf16 %v271_v17, %v270_v16  ;;  %v1090_v20 = vld [vmem:[%s1359_s2 + $0x70] sm:$0xff]   ;;  %v1091_v21 = vld [vmem:[%s1359_s2 + $0x78] sm:$0xff]  }
  0x1c   : > { %993 = vmatpush3.bf16.msra.mxu1 %v1077_v4  ;;  %v272_v22 = vld [vmem:[#allocation2] sm:$0xff]  ;;  %v273_v23 = vld [vmem:[#allocation2 + $0x8] sm:$0xff]  ;;  %v1094_v27 = vld [vmem:[%s1359_s2 + $0x90] sm:$0xff]  }
  0x1d   : > { %994 = vmatprep.subr.bf16.mxu1 %v1136_v3  ;;  %v274_v24 = vpack.c.bf16 %v273_v23, %v272_v22  ;;  %v1092_v25 = vld [vmem:[%s1359_s2 + $0x80] sm:$0xff]   ;;  %v1093_v26 = vld [vmem:[%s1359_s2 + $0x88] sm:$0xff]   ;;  %v1095_v28 = vld [vmem:[%s1359_s2 + $0x98] sm:$0xff]  }
  0x1e   : > { %973 = vmatpush3.bf16.msra.mxu0 %v1085_v8  ;;  %v1096_v29 = vld [vmem:[%s1359_s2 + $0xa0] sm:$0xff]   ;;  %v1097_v30 = vld [vmem:[%s1359_s2 + $0xa8] sm:$0xff]   ;;  %v1098_v31 = vld [vmem:[%s1359_s2 + $0xb0] sm:$0xff]  }
  0x1f   : > { %974 = vmatprep.subr.bf16.mxu0 %v1136_v3  ;;  %v1099_v32 = vld [vmem:[%s1359_s2 + $0xb8] sm:$0xff]   ;;  %v1100_v33 = vld [vmem:[%s1359_s2 + $0xc0] sm:$0xff]   ;;  %v1101_v34 = vld [vmem:[%s1359_s2 + $0xc8] sm:$0xff]  }
  0x20   : > { %995 = vmatpush3.bf16.msra.mxu1 %v1078_v5  ;;  %v1102_v35 = vld [vmem:[%s1359_s2 + $0xd0] sm:$0xff]   ;;  %v871_v36 = vld [vmem:[%s1360_s3] ss:$0 sm:$0xff]  ;;  %v1103_v50 = vld [vmem:[%s1359_s2 + $0xd8] sm:$0xff]  }
  0x21   : > { %996 = vmatprep.subr.bf16.mxu1 %v1136_v3  ;;  %v1104_v51 = vld [vmem:[%s1359_s2 + $0xe0] sm:$0xff]   ;;  %v1105_v52 = vld [vmem:[%s1359_s2 + $0xe8] sm:$0xff]   ;;  %v1106_v53 = vld [vmem:[%s1359_s2 + $0xf0] sm:$0xff]  }
  0x22   : > { %975 = vmatpush3.bf16.msra.mxu0 %v1086_v10  ;;  %v1107_v54 = vld [vmem:[%s1359_s2 + $0xf8] sm:$0xff]   ;;  %v904_v56 = vld [vmem:[%s1360_s3 + $0x1] ss:$0 sm:$0xff] }
  0x23   : > { %976 = vmatprep.subr.bf16.mxu0 %v1136_v3 }
  0x24   : > { %997 = vmatpush3.bf16.msra.mxu1 %v1079_v7 }
  0x25   : > { %998 = vmatprep.subr.bf16.mxu1 %v1136_v3 }
  0x26   : > { %977 = vmatpush3.bf16.msra.mxu0 %v1087_v12 }
  0x27   : > { %978 = vmatprep.subr.bf16.mxu0 %v1136_v3 }
  0x28   : > { %999 = vmatpush3.bf16.msra.mxu1 %v1080_v9 }
  0x29   : > { %1000 = vmatprep.subr.bf16.mxu1 %v1136_v3 }
  0x2a   : > { %979 = vmatpush3.bf16.msra.mxu0 %v1088_v14 }
  0x2b   : > { %980 = vmatprep.subr.bf16.mxu0 %v1136_v3 }
  0x2c   : > { %1001 = vmatpush3.bf16.msra.mxu1 %v1081_v11 }
  0x2d   : > { %1002 = vmatprep.subr.bf16.mxu1 %v1136_v3 }
  0x2e   : > { %981 = vmatpush3.bf16.msra.mxu0 %v1089_v18 }
  0x2f   : > { %982 = vmatprep.subr.bf16.mxu0 %v1136_v3 }
  0x30   : > { %1003 = vmatpush3.bf16.msra.mxu1 %v1082_v13 }
  0x31   : > { %1004 = vmatprep.subr.bf16.mxu1 %v1136_v3 }
  0x32   : > { %983 = vmatpush3.bf16.msra.mxu0 %v1090_v20 }
  0x33   : > { %984 = vmatprep.subr.bf16.mxu0 %v1136_v3 }
  0x34   : > { %1005 = vmatpush3.bf16.msra.mxu1 %v1083_v15 }
  0x35   : > { %1030 = vmatprep.subr.bf16.mxu1 %v1136_v3 }
  0x36   : > { %985 = vmatpush3.bf16.msra.mxu0 %v1091_v21 }
  0x37   : > { %1007 = vmatmul.mubr.bf16.vlgmr.msra.gmra.mrb[0].mxu1 %v381_v19  ;;  %1010 = vmatprep.subr.bf16.mxu0 %v1136_v3 }
  0x38   : > { %1046 = vmatprep.mubr.msk.bf16.mxu1 %vm1137_vm0, %v1136_v3  ;;  %1031 = vmatpush3.bf16.msra.mxu1 %v1100_v33 }
  0x39   : > { %987 = vmatmul.mubr.bf16.vlgmr.msra.gmra.mrb[0].mxu0 %v274_v24  ;;  %1032 = vmatprep.subr.bf16.mxu1 %v1136_v3 }
  0x3a   : > { %1011 = vmatpush3.bf16.msra.mxu0 %v1092_v25  ;;  %1026 = vmatprep.mubr.msk.bf16.mxu0 %vm1137_vm0, %v1136_v3 }
  0x3b   : > { %1012 = vmatprep.subr.bf16.mxu0 %v1136_v3 }
  0x3c   : > { %1033 = vmatpush3.bf16.msra.mxu1 %v1101_v34 }
  0x3d   : > { %1034 = vmatprep.subr.bf16.mxu1 %v1136_v3 }
  0x3e   : > { %1013 = vmatpush3.bf16.msra.mxu0 %v1093_v26 }
  0x3f   : > { %1014 = vmatprep.subr.bf16.mxu0 %v1136_v3 }
  0x40   : > { %1035 = vmatpush3.bf16.msra.mxu1 %v1102_v35 }
  0x41   : > { %1036 = vmatprep.subr.bf16.mxu1 %v1136_v3 }
  0x42   : > { %1015 = vmatpush3.bf16.msra.mxu0 %v1094_v27 }
  0x43   : > { %1016 = vmatprep.subr.bf16.mxu0 %v1136_v3 }
  0x44   : > { %1037 = vmatpush3.bf16.msra.mxu1 %v1103_v50 }
  0x45   : > { %1038 = vmatprep.subr.bf16.mxu1 %v1136_v3 }
  0x46   : > { %1017 = vmatpush3.bf16.msra.mxu0 %v1095_v28 }
  0x47   : > { %1018 = vmatprep.subr.bf16.mxu0 %v1136_v3 }
  0x48   : > { %1039 = vmatpush3.bf16.msra.mxu1 %v1104_v51 }
  0x49   : > { %1040 = vmatprep.subr.bf16.mxu1 %v1136_v3 }
  0x4a   : > { %1019 = vmatpush3.bf16.msra.mxu0 %v1096_v29 }
  0x4b   : > { %1020 = vmatprep.subr.bf16.mxu0 %v1136_v3 }
  0x4c   : > { %1041 = vmatpush3.bf16.msra.mxu1 %v1105_v52 }
  0x4d   : > { %1042 = vmatprep.subr.bf16.mxu1 %v1136_v3 }
  0x4e   : > { %1021 = vmatpush3.bf16.msra.mxu0 %v1097_v30 }
  0x4f   : > { %1022 = vmatprep.subr.bf16.mxu0 %v1136_v3 }
  0x50   : > { %1043 = vmatpush3.bf16.msra.mxu1 %v1106_v53 }
  0x51   : > { %1044 = vmatprep.subr.bf16.mxu1 %v1136_v3 }
  0x52   : > { %1023 = vmatpush3.bf16.msra.mxu0 %v1098_v31 }
  0x53   : > { %1024 = vmatprep.subr.bf16.mxu0 %v1136_v3  ;;  %v921_v3 = vld [vmem:[%s1360_s3 + $0x2] ss:$0 sm:$0xff] }
  0x54   : > { %1045 = vmatpush3.bf16.msra.mxu1 %v1107_v54 }
  0x56   : > { %1025 = vmatpush3.bf16.msra.mxu0 %v1099_v32 }
 0x10a   : > { %v485_v37 = vpop.f32.mrb[0].mxu1 }
 0x10b   : > { %v486_v38 = vadd.f32 %v871_v36, %v485_v37  ;;  %v1008_v39 = vpop.f32.mrb[1].mxu1 }
 0x10c   : > { %v488_v40 = vpop.f32.mrb[2].mxu1  ;;  %v374_v46 = vpop.f32.mrb[0].mxu0 }
 0x10d   : > { %v489_v41 = vadd.f32 %v871_v36, %v488_v40  ;;  %v1009_v42 = vpop.f32.mrb[3].mxu1  ;;  %v492_v43 = vmax.f32 %v486_v38, 0.0  ;;  %v988_v47 = vpop.f32.mrb[1].mxu0 }
 0x10e   : > { %v377_v48 = vpop.f32.mrb[2].mxu0 }
 0x10f   : > { %v493_v44 = vmax.f32 %v489_v41, 0.0  ;;  %v989_v49 = vpop.f32.mrb[3].mxu0 }
 0x111   : > { %v494_v45 = vpack.c.bf16 %v493_v44, %v492_v43 }
 0x113   : > { %1027 = vmatmul.mubr.bf16.vlgmr.msra.gmra.mrb[4].mxu0 %v494_v45 }
 0x1e6   : > { %v594_v55 = vpop.f32.mrb[4].mxu0 }
 0x1e7   : > { %v595_v57 = vadd.f32 %v594_v55, %v374_v46  ;;  %v1028_v58 = vpop.f32.mrb[5].mxu0 }
 0x1e8   : > { %v597_v59 = vpop.f32.mrb[6].mxu0 }
 0x1e9   : > { %v606_v60 = vadd.f32 %v904_v56, %v595_v57  ;;  %v598_v61 = vadd.f32 %v597_v59, %v377_v48  ;;  %v1029_v62 = vpop.f32.mrb[7].mxu0 }
 0x1eb   : > { %1108 = vtanh.f32 %v606_v60  ;;  %v607_v63 = vadd.f32 %v904_v56, %v598_v61 }
 0x1ed   : > { %1110 = vtanh.f32 %v607_v63 }
 0x1f5   : > { %v1109_v0 = vpop.eup %1108 }
 0x1f6   : > { %722 = vst [vmem:[#allocation2] sm:$0xff] %v1109_v0  ;;  %724 = vst [vmem:[%s1189_s27] sm:$0xff] %v1109_v0 }
 0x1f7   : > { %v1111_v1 = vpop.eup %1110 }
 0x1f8   : > { %723 = vst [vmem:[#allocation2 + $0x8] sm:$0xff] %v1111_v1  ;;  %725 = vst [vmem:[%s1189_s27 + $0x10] sm:$0xff] %v1111_v1  ;;  %v610_v2 = vpack.c.bf16 %v1111_v1, %v1109_v0 }
 0x1fa   : > { %1047 = vmatmul.mubr.bf16.vlgmr.msra.gmra.mrb[4].mxu1 %v610_v2 }
 0x2cd   : > { %v715_v4 = vpop.f32.mrb[4].mxu1 }
 0x2ce   : > { %v716_v5 = vadd.f32 %v921_v3, %v715_v4  ;;  %v1048_v6 = vpop.f32.mrb[5].mxu1 }
 0x2cf   : > { %v718_v7 = vpop.f32.mrb[6].mxu1 }
 0x2d0   : > { %726 = vst [vmem:[%s1189_s27 + $0x8] sm:$0xff] %v716_v5  ;;  %v719_v8 = vadd.f32 %v921_v3, %v718_v7  ;;  %v1049_v9 = vpop.f32.mrb[7].mxu1 }
 0x2d2   : > { %727 = vst [vmem:[%s1189_s27 + $0x18] sm:$0xff] %v719_v8 }
 0x2d3 PF: > { %s14_s17 = sadd.s32 1, %s1134_s17   ;;  %s1362_s15 = smov %s1130_s16 }
 0x2d4   : > { %p11_p6 = scmp.ge.s32.totalorder %s14_s17, 10   ;;  %s1363_s16 = smov %s1365_s18 }
 0x2d6   :  { %13 = sbr.rel (!%p11_p6) target bundleno = 2 (0x2), region = 76 }

</bundles_post_ra>
